<compile_context>
chip_gen: v7x
topology: tpu7x:2x2x1
jax: 0.10.0
libtpu: 0.0.40
codegen_flags: <defaults>
</compile_context>

<pallas_src>
import jax
import jax.numpy as jnp
from jax.experimental import pallas as pl
from jax.experimental.pallas import tpu as pltpu

# feature dims (feature-major layout: tensors are [C, N_gaussians])
C_OPA = 1
C_SCL = 3
C_ROT = 4
C_RAW = C_OPA + C_SCL + C_ROT   # 8 -> exactly one f32 sublane tile
C_LSH = 3                       # low-order SH (DC term, 3 color channels)
C_HSH = 45                      # high-order SH (deg 1..3, 15 coeffs * 3 ch)

_NORM_EPS = 1e-12               # torch.nn.functional.normalize default eps
_MIN_STEPS = 8                  # keep >=2 (ideally >=8) steps for 2-TC v7x
_VMEM_LIMIT_BYTES = 40 * 1024 * 1024


# ---------------------------------------------------------------------------
# kernel bodies
# ---------------------------------------------------------------------------
def _sigmoid(x):
    # sigmoid(x) = 0.5 * (tanh(x/2) + 1): a single EUP tanh, numerically
    # stable for large |x| (no exp overflow branch needed).
    return 0.5 * (jnp.tanh(0.5 * x) + 1.0)


def _normalize_quat(r):
    # x * rsqrt(max(sum(x^2), eps^2)) == x / max(||x||, eps)  (sqrt monotone),
    # matching torch.nn.functional.normalize semantics.
    sumsq = jnp.sum(r * r, axis=0, keepdims=True)
    inv = jax.lax.rsqrt(jnp.maximum(sumsq, _NORM_EPS * _NORM_EPS))
    return r * inv


def _gs_activation_kernel_split(op_ref, sc_ref, rot_ref,
                                opa_out, scl_out, rot_out):
    opa_out[...] = _sigmoid(op_ref[...])
    scl_out[...] = jnp.exp(sc_ref[...])
    rot_out[...] = _normalize_quat(rot_ref[...])


def _gs_activation_kernel_packed(raw_ref, opa_out, scl_out, rot_out):
    # raw rows: [0:1] raw opacity, [1:4] raw scales, [4:8] raw quaternions
    opa_out[...] = _sigmoid(raw_ref[0:C_OPA, :])
    scl_out[...] = jnp.exp(raw_ref[C_OPA:C_OPA + C_SCL, :])
    rot_out[...] = _normalize_quat(raw_ref[C_OPA + C_SCL:C_RAW, :])


# ---------------------------------------------------------------------------
# tiling / pallas_call plumbing
# ---------------------------------------------------------------------------
def _round_up(x, m):
    return ((x + m - 1) // m) * m


def _choose_tile(n, tile_n):
    """128-multiple tile; >=_MIN_STEPS steps when possible; capped at tile_n."""
    assert tile_n % 128 == 0, "tile_n must be a multiple of the 128-lane width"
    if n <= 128:
        return n  # single full-extent block (block dim == full array dim)
    target = _round_up(pl.cdiv(n, _MIN_STEPS), 128)
    return max(128, min(tile_n, target))


def _activation_call(kernel, inputs, in_channels, n, tile, dtype):
    grid = (pl.cdiv(n, tile),)
    col_map = lambda i: (0, i)
    return pl.pallas_call(
        kernel,
        out_shape=(jax.ShapeDtypeStruct((C_OPA, n), dtype),
                   jax.ShapeDtypeStruct((C_SCL, n), dtype),
                   jax.ShapeDtypeStruct((C_ROT, n), dtype)),
        grid_spec=pltpu.PrefetchScalarGridSpec(
            num_scalar_prefetch=0,
            grid=grid,
            in_specs=[pl.BlockSpec((c, tile), col_map) for c in in_channels],
            out_specs=[pl.BlockSpec((C_OPA, tile), col_map),
                       pl.BlockSpec((C_SCL, tile), col_map),
                       pl.BlockSpec((C_ROT, tile), col_map)]),
        compiler_params=pltpu.CompilerParams(
            dimension_semantics=("parallel",),
            vmem_limit_bytes=_VMEM_LIMIT_BYTES),
    )(*inputs)


# ---------------------------------------------------------------------------
# public wrappers
# ---------------------------------------------------------------------------
def concat_spherical_harmonics(low_sh, high_sh):
    """get_spherical_harmonics: pure data movement (materializes a copy).

    Prefer storing SH as one contiguous (48, N) parameter upstream and handing
    out row views, or passing low/high to the rasterizer separately.
    """
    return jnp.concatenate([low_sh, high_sh], axis=0)


def gs_model_forward(raw_opacity, scales_raw, rots_raw, low_sh, high_sh,
                     *, tile_n=65536, concat_sh=False):
    """Pallas version of the GSModel.forward activation pipeline.

    All tensors are feature-major ([C, N_gaussians]); callers holding the
    torch-style row-major [N, C] layout should transpose once upstream.

    Returns (opacity [1,N], scales [3,N], rots [4,N], spherical_harmonics).
    By default spherical_harmonics is the untouched (low_sh, high_sh) pair
    (zero extra HBM traffic); pass concat_sh=True to materialize the (48, N)
    concatenation.
    """
    n = raw_opacity.shape[1]
    assert raw_opacity.shape == (C_OPA, n)
    assert scales_raw.shape == (C_SCL, n)
    assert rots_raw.shape == (C_ROT, n)
    assert low_sh.ndim == 2 and low_sh.shape == (C_LSH, n)
    assert high_sh.ndim == 2 and high_sh.shape == (C_HSH, n)

    tile = _choose_tile(n, tile_n)
    opacity, scales, rots = _activation_call(
        _gs_activation_kernel_split,
        (raw_opacity, scales_raw, rots_raw),
        (C_OPA, C_SCL, C_ROT),
        n, tile, raw_opacity.dtype)

    sh = concat_spherical_harmonics(low_sh, high_sh) if concat_sh \
        else (low_sh, high_sh)
    return opacity, scales, rots, sh


def gs_model_forward_packed(raw_params, low_sh, high_sh,
                            *, tile_n=65536, concat_sh=False):
    """Same as gs_model_forward, but the raw gaussian parameters are stored as
    one (8, N) slab: row 0 = raw opacity, rows 1:4 = raw scales, rows 4:8 =
    raw quaternions.  One input DMA per grid step and full vreg sublane
    occupancy on the loads.
    """
    n = raw_params.shape[1]
    assert raw_params.shape == (C_RAW, n)
    assert low_sh.ndim == 2 and low_sh.shape == (C_LSH, n)
    assert high_sh.ndim == 2 and high_sh.shape == (C_HSH, n)

    tile = _choose_tile(n, tile_n)
    opacity, scales, rots = _activation_call(
        _gs_activation_kernel_packed,
        (raw_params,),
        (C_RAW,),
        n, tile, raw_params.dtype)

    sh = concat_spherical_harmonics(low_sh, high_sh) if concat_sh \
        else (low_sh, high_sh)
    return opacity, scales, rots, sh


# ---------------------------------------------------------------------------
# pure-JAX reference + self-test
# ---------------------------------------------------------------------------
def _reference(raw_opacity, scales_raw, rots_raw, low_sh, high_sh):
    opacity = jax.nn.sigmoid(raw_opacity)
    scales = jnp.exp(scales_raw)
    norm = jnp.sqrt(jnp.sum(rots_raw * rots_raw, axis=0, keepdims=True))
    rots = rots_raw / jnp.maximum(norm, _NORM_EPS)
    sh = jnp.concatenate([low_sh, high_sh], axis=0)
    return opacity, scales, rots, sh


def _check(got, want, name):
    assert got.shape == want.shape and got.dtype == want.dtype, name
    assert jnp.allclose(got, want, atol=1e-5, rtol=1e-5), name


if __name__ == "__main__":
    key = jax.random.PRNGKey(0)
    k1, k2, k3, k4, k5 = jax.random.split(key, 5)

    N = 1000  # not a multiple of 128 -> exercises the ragged last block

    raw_opacity = jax.random.normal(k1, (C_OPA, N), dtype=jnp.float32)
    scales_raw = jax.random.normal(k2, (C_SCL, N), dtype=jnp.float32) * 0.5
    rots_raw = jax.random.normal(k3, (C_ROT, N), dtype=jnp.float32)
    low_sh = jax.random.normal(k4, (C_LSH, N), dtype=jnp.float32)
    high_sh = jax.random.normal(k5, (C_HSH, N), dtype=jnp.float32)

    ref_opa, ref_scl, ref_rot, ref_sh = _reference(
        raw_opacity, scales_raw, rots_raw, low_sh, high_sh)

    # 1) default split-input path (multi-step grid, ragged last block);
    #    concat_sh=True only to validate the SH helper against the reference.
    opa, scl, rot, sh = gs_model_forward(
        raw_opacity, scales_raw, rots_raw, low_sh, high_sh, concat_sh=True)
    jax.block_until_ready((opa, scl, rot, sh))
    _check(opa, ref_opa, "opacity")
    _check(scl, ref_scl, "scales")
    _check(rot, ref_rot, "rots")
    _check(sh, ref_sh, "sh")

    # 2) packed-parameter fast path (single (8, N) raw slab -> one DMA/step)
    raw_slab = jnp.concatenate([raw_opacity, scales_raw, rots_raw], axis=0)
    opa2, scl2, rot2, (lo2, hi2) = gs_model_forward_packed(
        raw_slab, low_sh, high_sh)
    jax.block_until_ready((opa2, scl2, rot2, lo2, hi2))
    _check(opa2, ref_opa, "opacity_packed")
    _check(scl2, ref_scl, "scales_packed")
    _check(rot2, ref_rot, "rots_packed")
    _check(lo2, low_sh, "low_sh_passthrough")
    _check(hi2, high_sh, "high_sh_passthrough")

    # 3) tiny-N path (N <= 128 -> single full-extent block)
    Ns = 96
    opa3, scl3, rot3, _ = gs_model_forward(
        raw_opacity[:, :Ns], scales_raw[:, :Ns], rots_raw[:, :Ns],
        low_sh[:, :Ns], high_sh[:, :Ns])
    jax.block_until_ready((opa3, scl3, rot3))
    _check(opa3, ref_opa[:, :Ns], "opacity_small")
    _check(scl3, ref_scl[:, :Ns], "scales_small")
    _check(rot3, ref_rot[:, :Ns], "rots_small")

    print("KERNEL_OK")
</pallas_src>

<mosaic_0001>
module attributes {stable_mosaic.version = 11 : i64} {
  func.func @_gs_activation_kernel_split(%arg0: i32, %arg1: memref<1x128xf32, #tpu.memory_space<vmem>>, %arg2: memref<3x128xf32, #tpu.memory_space<vmem>>, %arg3: memref<4x128xf32, #tpu.memory_space<vmem>>, %arg4: memref<1x128xf32, #tpu.memory_space<vmem>>, %arg5: memref<3x128xf32, #tpu.memory_space<vmem>>, %arg6: memref<4x128xf32, #tpu.memory_space<vmem>>) attributes {dimension_semantics = [#tpu.dimension_semantics<parallel>], iteration_bounds = array<i64: 8>, scalar_prefetch = 0 : i64, scratch_operands = 0 : i64, tpu.core_type = #tpu.core_type<tc>, window_params = [{transform_indices = @transform_0, window_bounds = array<i64: 1, 128>}, {transform_indices = @transform_1, window_bounds = array<i64: 3, 128>}, {transform_indices = @transform_2, window_bounds = array<i64: 4, 128>}, {transform_indices = @transform_3, window_bounds = array<i64: 1, 128>}, {transform_indices = @transform_4, window_bounds = array<i64: 3, 128>}, {transform_indices = @transform_5, window_bounds = array<i64: 4, 128>}]} {
    %c0 = arith.constant 0 : index
    %c0_0 = arith.constant 0 : index
    %0 = vector.load %arg1[%c0, %c0_0] : memref<1x128xf32, #tpu.memory_space<vmem>>, vector<1x128xf32>
    %cst = arith.constant 5.000000e-01 : f32
    %1 = vector.broadcast %cst : f32 to vector<1x128xf32>
    %2 = arith.mulf %1, %0 : vector<1x128xf32>
    %3 = math.tanh %2 : vector<1x128xf32>
    %cst_1 = arith.constant 1.000000e+00 : f32
    %4 = vector.broadcast %cst_1 : f32 to vector<1x128xf32>
    %5 = arith.addf %3, %4 : vector<1x128xf32>
    %cst_2 = arith.constant 5.000000e-01 : f32
    %6 = vector.broadcast %cst_2 : f32 to vector<1x128xf32>
    %7 = arith.mulf %6, %5 : vector<1x128xf32>
    %c0_3 = arith.constant 0 : index
    %c0_4 = arith.constant 0 : index
    %8 = vector.load %arg4[%c0_3, %c0_4] : memref<1x128xf32, #tpu.memory_space<vmem>>, vector<1x128xf32>
    tpu.vector_store %arg4[%c0_3, %c0_4], %7 {strides = array<i32>} : memref<1x128xf32, #tpu.memory_space<vmem>>, vector<1x128xf32>,
    %c0_5 = arith.constant 0 : index
    %c0_6 = arith.constant 0 : index
    %9 = vector.load %arg2[%c0_5, %c0_6] : memref<3x128xf32, #tpu.memory_space<vmem>>, vector<3x128xf32>
    %10 = math.exp %9 : vector<3x128xf32>
    %c0_7 = arith.constant 0 : index
    %c0_8 = arith.constant 0 : index
    %11 = vector.load %arg5[%c0_7, %c0_8] : memref<3x128xf32, #tpu.memory_space<vmem>>, vector<3x128xf32>
    tpu.vector_store %arg5[%c0_7, %c0_8], %10 {strides = array<i32>} : memref<3x128xf32, #tpu.memory_space<vmem>>, vector<3x128xf32>,
    %c0_9 = arith.constant 0 : index
    %c0_10 = arith.constant 0 : index
    %12 = vector.load %arg3[%c0_9, %c0_10] : memref<4x128xf32, #tpu.memory_space<vmem>>, vector<4x128xf32>
    %13 = arith.mulf %12, %12 : vector<4x128xf32>
    %cst_11 = arith.constant dense<0.000000e+00> : vector<128xf32>
    %14 = vector.multi_reduction <add>, %13, %cst_11 [0] : vector<4x128xf32> to vector<128xf32>
    %15 = vector.shape_cast %14 : vector<128xf32> to vector<1x128xf32>
    %cst_12 = arith.constant 1.000000e-24 : f32
    %16 = vector.broadcast %cst_12 : f32 to vector<1x128xf32>
    %17 = arith.maximumf %15, %16 : vector<1x128xf32>
    %18 = math.rsqrt %17 : vector<1x128xf32>
    %19 = vector.broadcast %18 : vector<1x128xf32> to vector<4x128xf32>
    %20 = arith.mulf %12, %19 : vector<4x128xf32>
    %c0_13 = arith.constant 0 : index
    %c0_14 = arith.constant 0 : index
    %21 = vector.load %arg6[%c0_13, %c0_14] : memref<4x128xf32, #tpu.memory_space<vmem>>, vector<4x128xf32>
    tpu.vector_store %arg6[%c0_13, %c0_14], %20 {strides = array<i32>} : memref<4x128xf32, #tpu.memory_space<vmem>>, vector<4x128xf32>,
    return
  }
  func.func @transform_0(%arg0: i32) -> (i32, i32) {
    %c0_i32 = arith.constant 0 : i32
    %c0_i32_0 = arith.constant 0 : i32
    return %c0_i32, %arg0 : i32, i32
  }
  func.func @transform_1(%arg0: i32) -> (i32, i32) {
    %c0_i32 = arith.constant 0 : i32
    %c0_i32_0 = arith.constant 0 : i32
    return %c0_i32, %arg0 : i32, i32
  }
  func.func @transform_2(%arg0: i32) -> (i32, i32) {
    %c0_i32 = arith.constant 0 : i32
    %c0_i32_0 = arith.constant 0 : i32
    return %c0_i32, %arg0 : i32, i32
  }
  func.func @transform_3(%arg0: i32) -> (i32, i32) {
    %c0_i32 = arith.constant 0 : i32
    %c0_i32_0 = arith.constant 0 : i32
    return %c0_i32, %arg0 : i32, i32
  }
  func.func @transform_4(%arg0: i32) -> (i32, i32) {
    %c0_i32 = arith.constant 0 : i32
    %c0_i32_0 = arith.constant 0 : i32
    return %c0_i32, %arg0 : i32, i32
  }
  func.func @transform_5(%arg0: i32) -> (i32, i32) {
    %c0_i32 = arith.constant 0 : i32
    %c0_i32_0 = arith.constant 0 : i32
    return %c0_i32, %arg0 : i32, i32
  }
}

</mosaic_0001>

<bundles_post_ra>
// kernel: tpu_custom_call.1
= control target key start
LH: loop header
LB: loop body
LE: loop exit
PB: predicated region body
PF: predicated region fallthrough
CT: control target
= control target key end

     0   :  { %s1240_s0 = inlined_call_operand.hbm [shape: f32[1,1000], index: 0, kind: input, shape index: {}]   ;;  %s1241_s1 = inlined_call_operand.hbm [shape: f32[3,1000], index: 1, kind: input, shape index: {}]   ;;  %s1242_s2 = inlined_call_operand.hbm [shape: f32[4,1000], index: 2, kind: input, shape index: {}]   ;;  %s1243_s3 = inlined_call_operand.hbm [shape: f32[1,1000], index: 3, kind: output, shape index: {0}]   ;;  %s1244_s4 = inlined_call_operand.hbm [shape: f32[3,1000], index: 4, kind: output, shape index: {1}]   ;;  %s1245_s5 = inlined_call_operand.hbm [shape: f32[4,1000], index: 5, kind: output, shape index: {2}]  }
   0x1   :  { %1253 = sst [smem:[#allocation19_spill]] %s1241_s1 }
   0x2   :  { %11 = vsyncpa [#allocation3], 0 }
   0x3   :  { %13 = vsyncpa [#allocation3 + $0x1], 0 }
   0x4   :  { %14 = vsyncpa [#allocation6], 0 }
   0x5   :  { %16 = vsyncpa [#allocation6 + $0x1], 0 }
   0x6   :  { %17 = vsyncpa [#allocation4], 0 }
   0x7   :  { %19 = vsyncpa [#allocation4 + $0x1], 0 }
   0x8   :  { %20 = vsyncpa [#allocation10], 0 }
   0x9   :  { %22 = vsyncpa [#allocation10 + $0x1], 0  ;;  %s915_s18 = smov 0   ;;  %s917_s19 = smov 0  }
   0xa   :  { %s919_s20 = smov 0   ;;  %s921_s21 = smov 0  }
   0xb LB: > { %1254 = sst [smem:[#allocation16_spill]] %s873_s20  ;;  %s936_s22 = sadd.s32 4294967295, %s877_s21   ;;  %s877_s21 = sphi %s921_s21, %s1270_s21   ;;  %s873_s20 = sphi %s919_s20, %s1272_s20   ;;  %s869_s19 = sphi %s917_s19, %s1274_s19   ;;  %s865_s18 = sphi %s915_s18, %s1273_s18  }
   0xc   : > { %s1246_s23 = sadd.s32 4294967294, %s877_s21   ;;  %s940_s24 = sadd.s32 1, %s877_s21  }
   0xd   : > { %1255 = sst [smem:[#allocation17_spill]] %s940_s24  ;;  %s35_s25 = sadd.s32 1, %s873_s20 }
   0xe   : > { %s32_s26 = ssub.s32 %s877_s21, %s940_s24  ;;  %p42_p0 = scmp.ne.s32.totalorder %s873_s20, %s869_s19 }
   0xf   : > { %p33_p1 = scmp.eq.s32.totalorder %s32_s26, 0  ;;  %p43_p2 = scmp.eq.s32.totalorder %s877_s21, 0 }
  0x10   : > { %p48_p3 = scmp.ne.s32.totalorder %s869_s19, %s865_s18  ;;  %p49_p4 = scmp.eq.s32.totalorder %s936_s22, 0 }
  0x11   : > { %s952_s27 = scalar_select %p33_p1, %s873_s20, %s35_s25  }
  0x12   : > { %p44_p5 = por %p43_p2, %p42_p0  ;;  %p954_p6 = por %p49_p4, %p48_p3 }
  0x13   : > { %1256 = sst [smem:[#allocation18_spill]] %s952_s27  ;;  %p124_p7 = scmp.eq.s32.totalorder %s936_s22, 7 }
  0x14   : > { %s1257_s28 = scalar_select %p954_p6, 1, 0 }
  0x15   : > { %p130_p8 = scmp.eq.s32.totalorder %s1246_s23, 7  ;;  %p617_p9 = scmp.lt.s32.totalorder %s877_s21, 8 }
  0x16   : > { %p962_p10 = por %p124_p7, %p42_p0  ;;  %s971_s6 = sand.u32 1, %s873_s20  }
  0x17   : > { %p966_p11 = por %p130_p8, %p48_p3  ;;  %p973_p12 = pnand %p617_p9, %p44_p5 }
  0x18   : > { %s1258_s29 = scalar_select %p962_p10, 1, 0 }
  0x19   : > { %s1259_s30 = scalar_select %p966_p11, 1, 0 }
  0x1a   : > { %s219_s8 = sand.u32 1, %s877_s21   ;;  %s1249_s9 = sshll.u32 %s971_s6, 2 }
  0x1b   : > { %s570_s10 = sshll.u32 %s877_s21, 6  ;;  %s1261_s1 = sld [smem:[#allocation19_spill]] }
  0x1c   : > { %s223_s14 = scalar_lea.vmem [#allocation5], %s1249_s9  ;;  %s991_s16 = scalar_lea.sflag [#allocation6], %s219_s8 }
  0x1d   : > { %s230_s15 = sshll.u32 %s223_s14, 4  ;;  %p997_p0 = pneg %p973_p12  ;;  %s989_s15 = int_to_ptr.vmem [resolvable:$true] %s230_s15 }
  0x21   : > { %s985_s13 = scalar_lea.hbm %s1261_s1, %s570_s10  ;;  %s662_s12 = scalar_lea.hbm %s1261_s1, 512 }
  0x22   : > { %s657_s17 = scalar_lea.hbm %s985_s13, 64  ;;  %p663_p3 = scmp.lt.u32.totalorder %s985_s13, %s1261_s1 }
  0x23   : > { %p658_p13 = scmp.ne.s32.totalorder %s985_s13, %s657_s17  ;;  %p664_p4 = scmp.lt.u32.totalorder %s662_s12, %s657_s17 }
  0x24   : > { %p666_p7 = scmp.lt.u32.totalorder %s657_s17, %s985_s13 }
  0x25   : > { %p660_p1 = pnand %p997_p0, %p658_p13  ;;  %p665_p5 = por %p664_p4, %p663_p3 }
  0x27   : > { %p661_p2 = pneg %p660_p1  ;;  %p667_p8 = por %p666_p7, %p665_p5 }
  0x29   : > { %p668_p9 = pnand %p667_p8, %p661_p2 }
  0x2b   : > { %671 = shalt.err (!%p668_p9)
}
  0x2c   : > { %s672_s8 = scalar_lea.vmem %s989_s15, 64  ;;  %s879_s26 = smov [#allocation5]  }
  0x2d   : > { %p673_p13 = scmp.ne.s32.totalorder %s989_s15, %s672_s8  ;;  %s677_s11 = sshll.u32 %s879_s26, 4  ;;  %s678_s11 = int_to_ptr.vmem [resolvable:$false] %s677_s11 }
  0x2e   : > { %s679_s23 = scalar_lea.vmem %s678_s11, 128  ;;  %p680_p10 = scmp.lt.s32.totalorder %s989_s15, %s678_s11 }
  0x2f   : > { %p675_p1 = pnand %p673_p13, %p997_p0  ;;  %p681_p6 = scmp.lt.s32.totalorder %s679_s23, %s672_s8 }
  0x31   : > { %p676_p11 = pneg %p675_p1  ;;  %p682_p3 = por %p681_p6, %p680_p10 }
  0x33   : > { %p683_p4 = pnand %p682_p3, %p676_p11 }
  0x35   : > { %686 = shalt.err (!%p683_p4)
}
  0x36   : > { %603 = dma.hbm_to_vmem [thread:$0]  (!%p973_p12), %s985_s13, 64, %s989_s15, %s991_s16  }
  0x37   : > { %s1026_s14 = scalar_lea.hbm %s1242_s2, %s570_s10  ;;  %p573_p6 = scmp.ge.s32.totalorder %s877_s21, 1 }
  0x38   : > { %p253_p10 = scmp.lt.s32.totalorder %s877_s21, 9  ;;  %s568_s8 = sshll.u32 %s877_s21, 4 }
  0x39   : > { %s1038_s9 = scalar_lea.hbm %s1240_s0, %s568_s8  ;;  %s205_s13 = scalar_lea.vmem [#allocation2], %s971_s6 }
  0x3a   : > { %p1031_p11 = pnand %p573_p6, %p253_p10  ;;  %s212_s15 = sshll.u32 %s205_s13, 4  ;;  %s1043_s15 = int_to_ptr.vmem [resolvable:$true] %s212_s15 }
  0x3b   : > { %s1264_s10 = sshll.u32 %s971_s6, 2  ;;  %s203_s1 = scalar_lea.sflag [#allocation3], %s971_s6 }
  0x3c   : > { %s1263_s26 = scalar_select %p1031_p11, 1, 0 }
  0x3d   : > { %s241_s17 = scalar_lea.vmem [#allocation7], %s1264_s10  ;;  %s687_s27 = scalar_lea.hbm %s1038_s9, 16 }
  0x3e   : > { %s248_s12 = sshll.u32 %s241_s17, 4  ;;  %p688_p2 = scmp.ne.s32.totalorder %s1038_s9, %s687_s27  ;;  %s1045_s12 = int_to_ptr.vmem [resolvable:$true] %s248_s12 }
  0x3f   : > { %s692_s23 = scalar_lea.hbm %s1240_s0, 128  ;;  %p693_p8 = scmp.lt.u32.totalorder %s1038_s9, %s1240_s0 }
  0x40   : > { %p690_p5 = pnand %p688_p2, %p997_p0  ;;  %p694_p9 = scmp.lt.u32.totalorder %s692_s23, %s687_s27 }
  0x41   : > { %p696_p1 = scmp.lt.u32.totalorder %s687_s27, %s1038_s9 }
  0x42   : > { %p691_p7 = pneg %p690_p5  ;;  %p695_p13 = por %p694_p9, %p693_p8 }
  0x44   : > { %p697_p3 = por %p696_p1, %p695_p13 }
  0x46   : > { %p698_p4 = pnand %p697_p3, %p691_p7 }
  0x48   : > { %701 = shalt.err (!%p698_p4)
}
  0x49   : > { %s702_s6 = scalar_lea.vmem %s1043_s15, 16  ;;  %s880_s13 = smov [#allocation2]  }
  0x4a   : > { %p703_p6 = scmp.ne.s32.totalorder %s1043_s15, %s702_s6  ;;  %s707_s10 = sshll.u32 %s880_s13, 4  ;;  %s708_s10 = int_to_ptr.vmem [resolvable:$false] %s707_s10 }
  0x4b   : > { %s709_s20 = scalar_lea.vmem %s708_s10, 32  ;;  %p710_p5 = scmp.lt.s32.totalorder %s1043_s15, %s708_s10 }
  0x4c   : > { %p705_p10 = pnand %p703_p6, %p997_p0  ;;  %p711_p11 = scmp.lt.s32.totalorder %s709_s20, %s702_s6 }
  0x4e   : > { %p706_p2 = pneg %p705_p10  ;;  %p712_p8 = por %p711_p11, %p710_p5 }
  0x50   : > { %p713_p9 = pnand %p712_p8, %p706_p2 }
  0x52   : > { %716 = shalt.err (!%p713_p9)
}
  0x53   : > { %600 = dma.hbm_to_vmem [thread:$0]  (!%p973_p12), %s1038_s9, 16, %s1043_s15, %s203_s1  }
  0x54   : > { %s717_s24 = scalar_lea.hbm %s1026_s14, 64  ;;  %s722_s8 = scalar_lea.hbm %s1242_s2, 512 }
  0x55   : > { %p718_p7 = scmp.ne.s32.totalorder %s1026_s14, %s717_s24  ;;  %p723_p11 = scmp.lt.u32.totalorder %s1026_s14, %s1242_s2 }
  0x56   : > { %p724_p3 = scmp.lt.u32.totalorder %s722_s8, %s717_s24  ;;  %p726_p6 = scmp.lt.u32.totalorder %s717_s24, %s1026_s14 }
  0x57   : > { %p720_p13 = pnand %p718_p7, %p997_p0 }
  0x58   : > { %p725_p4 = por %p724_p3, %p723_p11 }
  0x59   : > { %p721_p1 = pneg %p720_p13 }
  0x5a   : > { %p727_p10 = por %p726_p6, %p725_p4 }
  0x5c   : > { %p728_p2 = pnand %p727_p10, %p721_p1 }
  0x5e   : > { %731 = shalt.err (!%p728_p2)
}
  0x5f   : > { %s732_s1 = scalar_lea.vmem %s1045_s12, 64  ;;  %s881_s9 = smov [#allocation7]  }
  0x60   : > { %p733_p5 = scmp.ne.s32.totalorder %s1045_s12, %s732_s1  ;;  %s737_s15 = sshll.u32 %s881_s9, 4  ;;  %s738_s15 = int_to_ptr.vmem [resolvable:$false] %s737_s15 }
  0x61   : > { %s739_s6 = scalar_lea.vmem %s738_s15, 128  ;;  %p740_p7 = scmp.lt.s32.totalorder %s1045_s12, %s738_s15 }
  0x62   : > { %p735_p8 = pnand %p733_p5, %p997_p0  ;;  %p741_p13 = scmp.lt.s32.totalorder %s739_s6, %s732_s1 }
  0x64   : > { %p736_p9 = pneg %p735_p8  ;;  %p742_p11 = por %p741_p13, %p740_p7 }
  0x66   : > { %p743_p3 = pnand %p742_p11, %p736_p9 }
  0x68   : > { %746 = shalt.err (!%p743_p3)
}
  0x69   : > { %606 = dma.hbm_to_vmem [thread:$0]  (!%p973_p12), %s1026_s14, 64, %s1045_s12, %s991_s16  }
  0x6a   : > { %p1265_p1 = scmp.ne.s32.totalorder %s1263_s26, 0 }
  0x6b   : > { %s1094_s25 = sand.u32 (!%p1265_p1), 1, %s869_s19   ;;  %p1266_p0 = scmp.ne.s32.totalorder (!%p1265_p1), %s1257_s28, 0 }
  0x6c   : > { %257 = sbr.rel (%p1265_p1) target bundleno = 196 (0xc4), region = 32  ;;  %s260_s13 = scalar_lea.sflag (!%p1265_p1), [#allocation3], %s1094_s25 }
  0x6d   : > { %s262_s10 = scalar_lea.vmem (!%p1265_p1), [#allocation2], %s1094_s25 }
  0x73   : > { %848 = dma.done.wait (%p1266_p0), %s260_s13, 16  }
  0x74   : > { %850 = vsyncadd (%p1266_p0), %s260_s13, 4294967280  ;;  %s267_s7 = sand.u32 1, %s936_s22   ;;  %s1104_s16 = sshll.u32 %s1094_s25, 2 }
  0x75   : > { %s268_s14 = scalar_lea.sflag [#allocation6], %s267_s7  ;;  %s271_s26 = scalar_lea.vmem [#allocation5], %s1104_s16 }
  0x76   : > { %852 = dma.done.wait (%p1266_p0), %s268_s14, 128  }
  0x77   : > { %854 = vsyncadd (%p1266_p0), %s268_s14, 4294967168  ;;  %vm337_vm0 = vcmask 1043456   ;;  %v331_v0 = vld [vmem:[%s271_s26] sm:$0x7]  ;;  %v325_v1 = vld [vmem:[%s262_s10] sm:$0x1] }
  0x78   : > { %s280_s12 = scalar_lea.vmem [#allocation7], %s1104_s16  ;;  %v332_v3 = vmul.f32 1.442695, %v331_v0  ;;  %v326_v4 = vmul.f32 0.5, %v325_v1  ;;  %s317_s28 = scalar_lea.vmem [#allocation9], %s1104_s16 }
  0x79   : > { %v1114_v2 = vld [vmem:[%s280_s12] sm:$0xf]  ;;  %s385_s20 = sshll.u32 %s317_s28, 4  ;;  %s581_s24 = sshll.u32 %s936_s22, 6  ;;  %s1120_s20 = int_to_ptr.vmem [resolvable:$true] %s385_s20 }
  0x7a   : > { %v336_v5 = vmul.f32 %v1114_v2, %v1114_v2  ;;  %651 = vpow2.f32 %v332_v3  ;;  %s1127_s8 = scalar_lea.hbm %s1244_s4, %s581_s24  ;;  %s310_s11 = scalar_lea.vmem [#allocation8], %s1094_s25 }
  0x7b   : > { %653 = vtanh.f32 %v326_v4  ;;  %s1132_s23 = sshll.u32 %s310_s11, 4  ;;  %s580_s1 = sshll.u32 %s936_s22, 4  ;;  %s1162_s23 = int_to_ptr.vmem [resolvable:$true] %s1132_s23 }
  0x7c   : > { %v338_v6 = vsel %vm337_vm0, %v336_v5, 0.0  ;;  %s1137_s9 = scalar_lea.sflag [#allocation10], %s267_s7  ;;  %s747_s15 = scalar_lea.vmem %s1120_s20, 64 }
  0x7d   : > { %v339_v7 = vrot.slane %v338_v6, 4  ;;  %p748_p12 = scmp.ne.s32.totalorder %s1120_s20, %s747_s15  ;;  %p1267_p4 = scmp.ne.s32.totalorder %s1258_s29, 0 }
  0x7e   : > { %s882_s6 = smov [#allocation9]  }
  0x7f   : > { %v340_v8 = vadd.f32 %v339_v7, %v338_v6  ;;  %p749_p6 = pnand %p748_p12, %p1267_p4  ;;  %s751_s13 = sshll.u32 %s882_s6, 4  ;;  %s752_s13 = int_to_ptr.vmem [resolvable:$false] %s751_s13 }
  0x80   : > { %s753_s10 = scalar_lea.vmem %s752_s13, 128  ;;  %p754_p2 = scmp.lt.s32.totalorder %s1120_s20, %s752_s13 }
  0x81   : > { %v341_v9 = vrot.slane %v340_v8, 2  ;;  %p750_p10 = pneg %p749_p6  ;;  %p755_p5 = scmp.lt.s32.totalorder %s753_s10, %s747_s15 }
  0x83   : > { %v342_v10 = vadd.f32 %v341_v9, %v340_v8  ;;  %p756_p8 = por %p755_p5, %p754_p2 }
  0x84   : > { %v652_v12 = vpop.eup %651 }
  0x85   : > { %v343_v11 = vrot.slane %v342_v10, 1  ;;  %v654_v13 = vpop.eup %653  ;;  %334 = vst [vmem:[%s317_s28] sm:$0x7] %v652_v12  ;;  %p757_p9 = pnand %p756_p8, %p750_p10 }
  0x86   : > { %v328_v15 = vadd.f32 1.0, %v654_v13 }
  0x87   : > { %v344_v14 = vadd.f32 %v343_v11, %v342_v10 }
  0x88   : > { %760 = shalt.err (!%p757_p9)
}
  0x89   : > { %s761_s7 = scalar_lea.hbm %s1127_s8, 64  ;;  %s765_s12 = scalar_lea.hbm %s1244_s4, 512 }
  0x8a   : > { %p762_p7 = scmp.ne.s32.totalorder %s1127_s8, %s761_s7  ;;  %p766_p3 = scmp.lt.u32.totalorder %s1127_s8, %s1244_s4 }
  0x8b   : > { %p767_p1 = scmp.lt.u32.totalorder %s765_s12, %s761_s7  ;;  %p769_p12 = scmp.lt.u32.totalorder %s761_s7, %s1127_s8 }
  0x8c   : > { %p763_p13 = pnand %p762_p7, %p1267_p4 }
  0x8d   : > { %p768_p0 = por %p767_p1, %p766_p3 }
  0x8e   : > { %p764_p11 = pneg %p763_p13 }
  0x8f   : > { %p770_p6 = por %p769_p12, %p768_p0 }
  0x91   : > { %p771_p10 = pnand %p770_p6, %p764_p11 }
  0x93   : > { %774 = shalt.err (!%p771_p10)
}
  0x94   : > { %592 = dma.vmem_to_hbm [thread:$0]  (%p1267_p4), %s1120_s20, 64, %s1127_s8, %s1137_s9   ;;  %v345_v16 = vmax.f32 %v344_v14, 1e-24  ;;  %v329_v17 = vmul.f32 0.5, %v328_v15 }
  0x95   : > { %s1169_s6 = scalar_lea.hbm %s1243_s3, %s580_s1  ;;  %s350_s13 = scalar_lea.sflag [#allocation4], %s1094_s25 }
  0x96   : > { %655 = vrsqrt.f32 %v345_v16  ;;  %330 = vst [vmem:[%s310_s11] sm:$0x1] %v329_v17  ;;  %s775_s10 = scalar_lea.vmem %s1162_s23, 16  ;;  %s883_s20 = smov [#allocation8]  }
  0x97   : > { %p776_p2 = scmp.ne.s32.totalorder %s1162_s23, %s775_s10  ;;  %s779_s8 = sshll.u32 %s883_s20, 4  ;;  %s780_s8 = int_to_ptr.vmem [resolvable:$false] %s779_s8 }
  0x98   : > { %s781_s7 = scalar_lea.vmem %s780_s8, 32  ;;  %p782_p9 = scmp.lt.s32.totalorder %s1162_s23, %s780_s8 }
  0x99   : > { %p777_p5 = pnand %p776_p2, %p1267_p4  ;;  %p783_p7 = scmp.lt.s32.totalorder %s781_s7, %s775_s10 }
  0x9b   : > { %p778_p8 = pneg %p777_p5  ;;  %p784_p13 = por %p783_p7, %p782_p9 }
  0x9d   : > { %p785_p11 = pnand %p784_p13, %p778_p8 }
  0x9f   : > { %788 = shalt.err (!%p785_p11)
}
  0xa0   : > { %s789_s25 = scalar_lea.hbm %s1169_s6, 16  ;;  %s793_s14 = scalar_lea.hbm %s1243_s3, 128 }
  0xa1   : > { %p790_p3 = scmp.ne.s32.totalorder %s1169_s6, %s789_s25  ;;  %p794_p12 = scmp.lt.u32.totalorder %s1169_s6, %s1243_s3 }
  0xa2   : > { %p795_p6 = scmp.lt.u32.totalorder %s793_s14, %s789_s25  ;;  %p797_p2 = scmp.lt.u32.totalorder %s789_s25, %s1169_s6 }
  0xa3   : > { %p791_p1 = pnand %p790_p3, %p1267_p4 }
  0xa4   : > { %p796_p10 = por %p795_p6, %p794_p12 }
  0xa5   : > { %p792_p0 = pneg %p791_p1 }
  0xa6   : > { %p798_p5 = por %p797_p2, %p796_p10 }
  0xa8   : > { %p799_p8 = pnand %p798_p5, %p792_p0 }
  0xaa   : > { %802 = shalt.err (!%p799_p8)
}
  0xab   : > { %591 = dma.vmem_to_hbm [thread:$0]  (%p1267_p4), %s1162_s23, 16, %s1169_s6, %s350_s13   ;;  %v656_v18 = vpop.eup %655 }
  0xac   : > { %s324_s28 = scalar_lea.vmem [#allocation11], %s1104_s16  ;;  %v347_v19 = vmul.f32 %v656_v18, %v1114_v2  ;;  %s396_s10 = scalar_lea.hbm %s1245_s5, %s581_s24 }
  0xad   : > { %s398_s27 = sshll.u32 %s324_s28, 4  ;;  %s884_s16 = smov [#allocation11]   ;;  %s1197_s27 = int_to_ptr.vmem [resolvable:$true] %s398_s27 }
  0xae   : > { %348 = vst [vmem:[%s324_s28] sm:$0xf] %v347_v19  ;;  %s803_s20 = scalar_lea.vmem %s1197_s27, 64  ;;  %s807_s23 = sshll.u32 %s884_s16, 4  ;;  %s808_s23 = int_to_ptr.vmem [resolvable:$false] %s807_s23 }
  0xaf   : > { %p804_p9 = scmp.ne.s32.totalorder %s1197_s27, %s803_s20  ;;  %s809_s6 = scalar_lea.vmem %s808_s23, 128 }
  0xb0   : > { %p810_p11 = scmp.lt.s32.totalorder %s1197_s27, %s808_s23  ;;  %p811_p3 = scmp.lt.s32.totalorder %s809_s6, %s803_s20 }
  0xb1   : > { %p805_p7 = pnand %p804_p9, %p1267_p4 }
  0xb2   : > { %p812_p1 = por %p811_p3, %p810_p11 }
  0xb3   : > { %p806_p13 = pneg %p805_p7 }
  0xb5   : > { %p813_p0 = pnand %p812_p1, %p806_p13 }
  0xb7   : > { %816 = shalt.err (!%p813_p0)
}
  0xb8   : > { %s817_s22 = scalar_lea.hbm %s396_s10, 64  ;;  %s821_s8 = scalar_lea.hbm %s1245_s5, 512 }
  0xb9   : > { %p818_p12 = scmp.ne.s32.totalorder %s396_s10, %s817_s22  ;;  %p822_p2 = scmp.lt.u32.totalorder %s396_s10, %s1245_s5 }
  0xba   : > { %p823_p5 = scmp.lt.u32.totalorder %s821_s8, %s817_s22  ;;  %p825_p9 = scmp.lt.u32.totalorder %s817_s22, %s396_s10 }
  0xbb   : > { %p819_p6 = pnand %p818_p12, %p1267_p4 }
  0xbc   : > { %p824_p8 = por %p823_p5, %p822_p2 }
  0xbd   : > { %p820_p10 = pneg %p819_p6 }
  0xbe   : > { %p826_p7 = por %p825_p9, %p824_p8 }
  0xc0   : > { %p827_p13 = pnand %p826_p7, %p820_p10 }
  0xc2   : > { %830 = shalt.err (!%p827_p13)
}
  0xc3   : > { %593 = dma.vmem_to_hbm [thread:$0]  (%p1267_p4), %s1197_s27, 64, %s396_s10, %s1137_s9  }
  0xc4 PF: > { %p618_p11 = scmp.ge.s32.totalorder %s877_s21, 2  ;;  %s410_s11 = sand.u32 1, %s865_s18  }
  0xc5   : > { %p1268_p3 = scmp.ne.s32.totalorder %s1259_s30, 0  ;;  %s411_s1 = scalar_lea.sflag [#allocation4], %s410_s11 }
  0xc7   : > { %p608_p1 = pnand %p618_p11, %p1268_p3 }
  0xc9   : > { %856 = dma.done.wait (!%p608_p1), %s411_s1, 16  }
  0xca   : > { %858 = vsyncadd (!%p608_p1), %s411_s1, 4294967280  ;;  %s1269_s14 = sadd.s32 4294967294, %s877_s21  }
  0xcb   : > { %s418_s26 = sand.u32 1, %s1269_s14  }
  0xcc   : > { %s419_s12 = scalar_lea.sflag [#allocation10], %s418_s26 }
  0xcd   : > { %860 = dma.done.wait (!%p608_p1), %s419_s12, 128  }
  0xce   : > { %862 = vsyncadd (!%p608_p1), %s419_s12, 4294967168  ;;  %s1270_s21 = sld [smem:[#allocation17_spill]]  ;;  %s1271_s29 = sld [smem:[#allocation16_spill]] }
  0xcf   : > { %s1272_s20 = sld [smem:[#allocation18_spill]]  ;;  %s1273_s18 = smov %s869_s19 }
  0xd4   : > { %p25_p4 = scmp.ge.s32.totalorder %s1270_s21, 10   ;;  %s1274_s19 = smov %s1271_s29 }
  0xd6   :  { %27 = sbr.rel (!%p25_p4) target bundleno = 11 (0xb), region = 133 }
  0xdd   :  { %433 = vsyncpa [#allocation3], 1 }
  0xde   :  { %435 = vsyncpa [#allocation3 + $0x1], 1 }
  0xdf   :  { %436 = vsyncpa [#allocation6], 1 }
  0xe0   :  { %438 = vsyncpa [#allocation6 + $0x1], 1 }
  0xe1   :  { %439 = vsyncpa [#allocation4], 1 }
  0xe2   :  { %441 = vsyncpa [#allocation4 + $0x1], 1 }
  0xe3   :  { %442 = vsyncpa [#allocation10], 1 }
  0xe4   :  { %444 = vsyncpa [#allocation10 + $0x1], 1 }

</bundles_post_ra>
